<compile_context>
chip_gen: v7x
topology: tpu7x:2x2x1
jax: 0.10.0
libtpu: 0.0.40
codegen_flags: <defaults>
</compile_context>

<pallas_src>
import math
import functools

import jax
import jax.numpy as jnp
from jax.experimental import pallas as pl
from jax.experimental.pallas import tpu as pltpu


# ----------------------------------------------------------------------------
# Helpers
# ----------------------------------------------------------------------------
def _round_up(v, m):
    return ((v + m - 1) // m) * m


def _pad2d(a, rows, cols):
    r, c = a.shape
    if r == rows and c == cols:
        return a
    return jnp.pad(a, ((0, rows - r), (0, cols - c)))


# ----------------------------------------------------------------------------
# Fused kernel:  out[i, j] = sum_k  G[i, k] @ (x[k] @ W[:, j] + b[j])
# ----------------------------------------------------------------------------
def _hgnn_fused_kernel(g_ref, x_ref, w_ref, b_ref, o_ref, acc_ref):
    @pl.when(pl.program_id(2) == 0)
    def _():
        acc_ref[...] = jnp.zeros_like(acc_ref)

    # First matmul tile: (tk, in_ft) @ (in_ft, tn) -> f32, plus bias.
    xw = jnp.dot(x_ref[...], w_ref[...], preferred_element_type=jnp.float32)
    xw = xw + b_ref[...]                       # (1, tn) broadcasts over rows

    # Second matmul tile: (tm, tk) @ (tk, tn), accumulated in f32 on the MXU.
    acc_ref[...] += jnp.dot(
        g_ref[...], xw.astype(g_ref.dtype), preferred_element_type=jnp.float32
    )

    @pl.when(pl.program_id(2) == pl.num_programs(2) - 1)
    def _():
        o_ref[...] = acc_ref[...].astype(o_ref.dtype)


# ----------------------------------------------------------------------------
# Wrapper
# ----------------------------------------------------------------------------
@functools.partial(jax.jit, static_argnames=("tm", "tn", "tk", "compute_dtype"))
def hgnn_conv(x, G, weight, bias=None, *, tm=None, tn=None, tk=None,
              compute_dtype=jnp.bfloat16):
    """Pallas implementation of HGNN_conv.forward: G @ (x @ W + b)."""
    N, in_ft = x.shape
    in_ft2, out_ft = weight.shape
    assert in_ft2 == in_ft
    M, Nk = G.shape
    assert Nk == N

    out_dtype = x.dtype

    # ---- tile selection (multiples of 128, <= 512 so v7x VMEM is safe) ----
    m128 = _round_up(M, 128)
    n128 = _round_up(N, 128)
    k128 = _round_up(in_ft, 128)   # full in_ft kept resident; W fetched per j only
    o128 = _round_up(out_ft, 128)

    if tm is None:
        # Larger tm bounds the x@W recompute / x re-fetch overhead at
        # in_ft/tm, while still leaving >= 2 i-steps for v7x megacore.
        tm = 512 if m128 >= 1024 else (256 if m128 >= 512 else 128)
    tm = min(tm, m128)
    if tk is None:
        tk = min(512, n128)
    tk = min(tk, n128)
    if tn is None:
        tn = min(512, o128)
    tn = min(tn, o128)

    grid_i = pl.cdiv(M, tm)
    grid_j = pl.cdiv(out_ft, tn)
    grid_k = pl.cdiv(N, tk)

    M_pad = grid_i * tm
    O_pad = grid_j * tn
    N_pad = grid_k * tk
    K_pad = k128

    # ---- pad + cast operands. Zero padding is exact: padded G columns are 0,
    # so padded xw rows (which carry the bias) contribute nothing; padded
    # in_ft/out_ft columns are zero in W / bias and are sliced off below. ----
    g_p = _pad2d(G.astype(compute_dtype), M_pad, N_pad)
    x_p = _pad2d(x.astype(compute_dtype), N_pad, K_pad)
    w_p = _pad2d(weight.astype(compute_dtype), K_pad, O_pad)
    if bias is None:
        b_p = jnp.zeros((1, O_pad), jnp.float32)
    else:
        b_p = _pad2d(bias.reshape(1, out_ft).astype(jnp.float32), 1, O_pad)

    # Advisory cost estimate (includes the per-i recompute of the small x@W).
    bpe = jnp.dtype(compute_dtype).itemsize
    flops = 2 * M_pad * N_pad * O_pad + 2 * grid_i * N_pad * K_pad * O_pad
    bytes_accessed = (
        grid_j * M_pad * N_pad * bpe                # G, re-read per j-stripe
        + grid_i * grid_j * N_pad * K_pad * bpe     # x, re-read per (i, j)
        + K_pad * O_pad * bpe                       # W, fetched once per j
        + O_pad * 4                                 # bias
        + M_pad * O_pad * jnp.dtype(out_dtype).itemsize
    )

    out_p = pl.pallas_call(
        _hgnn_fused_kernel,
        out_shape=jax.ShapeDtypeStruct((M_pad, O_pad), out_dtype),
        grid_spec=pltpu.PrefetchScalarGridSpec(
            num_scalar_prefetch=0,
            grid=(grid_i, grid_j, grid_k),
            in_specs=[
                pl.BlockSpec((tm, tk), lambda i, j, k: (i, k)),      # G tile
                pl.BlockSpec((tk, K_pad), lambda i, j, k: (k, 0)),   # x stripe
                pl.BlockSpec((K_pad, tn), lambda i, j, k: (0, j)),   # W (resident per j)
                pl.BlockSpec((1, tn), lambda i, j, k: (0, j)),       # bias (resident per j)
            ],
            out_specs=pl.BlockSpec((tm, tn), lambda i, j, k: (i, j)),
            scratch_shapes=[pltpu.VMEM((tm, tn), jnp.float32)],
        ),
        compiler_params=pltpu.CompilerParams(
            dimension_semantics=("parallel", "parallel", "arbitrary")
        ),
        cost_estimate=pl.CostEstimate(
            flops=int(flops), transcendentals=0, bytes_accessed=int(bytes_accessed)
        ),
    )(g_p, x_p, w_p, b_p)

    return out_p[:M, :out_ft]


# ----------------------------------------------------------------------------
# Deterministic parameter init (mirrors reset_parameters: U(-stdv, stdv),
# stdv = 1/sqrt(out_ft))
# ----------------------------------------------------------------------------
def init_params(key, in_ft, out_ft, dtype=jnp.float32):
    stdv = 1.0 / math.sqrt(out_ft)
    kw, kb = jax.random.split(key)
    weight = jax.random.uniform(kw, (in_ft, out_ft), dtype, -stdv, stdv)
    bias = jax.random.uniform(kb, (out_ft,), dtype, -stdv, stdv)
    return weight, bias


# ----------------------------------------------------------------------------
# Self-test
# ----------------------------------------------------------------------------
if __name__ == "__main__":
    def run_case(key, N, in_ft, out_ft):
        kx, kg, kp = jax.random.split(key, 3)
        x = jax.random.normal(kx, (N, in_ft), jnp.float32)
        G = jax.random.normal(kg, (N, N), jnp.float32)
        weight, bias = init_params(kp, in_ft, out_ft)

        out = jax.block_until_ready(hgnn_conv(x, G, weight, bias))
        assert out.shape == (N, out_ft)

        # Reference with matching bf16 operand precision + f32 accumulation.
        xb, Gb, wb = (a.astype(jnp.bfloat16) for a in (x, G, weight))
        xw = jnp.dot(xb, wb, preferred_element_type=jnp.float32) + bias
        ref = jnp.dot(Gb, xw.astype(jnp.bfloat16),
                      preferred_element_type=jnp.float32)
        assert jnp.allclose(out, ref, atol=2e-2, rtol=2e-2), \
            f"mismatch vs reference for shape N={N}, in={in_ft}, out={out_ft}"

    key = jax.random.PRNGKey(0)
    k1, k2 = jax.random.split(key)
    # Tile-aligned case and a ragged (non-multiple-of-128) case.
    run_case(k1, N=256, in_ft=128, out_ft=128)
    run_case(k2, N=200, in_ft=96, out_ft=80)

    print("KERNEL_OK")
</pallas_src>

<mosaic_0001>
module attributes {stable_mosaic.version = 11 : i64} {
  func.func @_hgnn_fused_kernel(%arg0: i32, %arg1: i32, %arg2: i32, %arg3: memref<128x256xbf16, #tpu.memory_space<vmem>>, %arg4: memref<256x128xbf16, #tpu.memory_space<vmem>>, %arg5: memref<128x128xbf16, #tpu.memory_space<vmem>>, %arg6: memref<1x128xf32, #tpu.memory_space<vmem>>, %arg7: memref<128x128xf32, #tpu.memory_space<vmem>>, %arg8: memref<128x128xf32, #tpu.memory_space<vmem>>) attributes {dimension_semantics = [#tpu.dimension_semantics<parallel>, #tpu.dimension_semantics<parallel>, #tpu.dimension_semantics<arbitrary>], iteration_bounds = array<i64: 2, 1, 1>, scalar_prefetch = 0 : i64, scratch_operands = 1 : i64, tpu.core_type = #tpu.core_type<tc>, window_params = [{transform_indices = @transform_0, window_bounds = array<i64: 128, 256>}, {transform_indices = @transform_1, window_bounds = array<i64: 256, 128>}, {transform_indices = @transform_2, window_bounds = array<i64: 128, 128>}, {transform_indices = @transform_3, window_bounds = array<i64: 1, 128>}, {transform_indices = @transform_4, window_bounds = array<i64: 128, 128>}]} {
    %c0_i32 = arith.constant 0 : i32
    %0 = arith.cmpi eq, %arg2, %c0_i32 : i32
    %1 = arith.extui %0 : i1 to i32
    %c0_i32_0 = arith.constant 0 : i32
    %2 = arith.cmpi ne, %1, %c0_i32_0 : i32
    scf.if %2 {
      %cst_15 = arith.constant 0.000000e+00 : f32
      %18 = vector.broadcast %cst_15 : f32 to vector<128x128xf32>
      %c0_16 = arith.constant 0 : index
      %c0_17 = arith.constant 0 : index
      %19 = vector.load %arg8[%c0_16, %c0_17] : memref<128x128xf32, #tpu.memory_space<vmem>>, vector<128x128xf32>
      tpu.vector_store %arg8[%c0_16, %c0_17], %18 {strides = array<i32>} : memref<128x128xf32, #tpu.memory_space<vmem>>, vector<128x128xf32>,
    } else {
    }
    %c0 = arith.constant 0 : index
    %c0_1 = arith.constant 0 : index
    %3 = vector.load %arg4[%c0, %c0_1] : memref<256x128xbf16, #tpu.memory_space<vmem>>, vector<256x128xbf16>
    %c0_2 = arith.constant 0 : index
    %c0_3 = arith.constant 0 : index
    %4 = vector.load %arg5[%c0_2, %c0_3] : memref<128x128xbf16, #tpu.memory_space<vmem>>, vector<128x128xbf16>
    %cst = arith.constant dense<0.000000e+00> : vector<256x128xf32>
    %5 = tpu.matmul %3, %4, %cst {dimension_numbers = #tpu.dot_dimension_numbers<[1], [0], [0], [1], [0, 0, 1, 1], [], []>} : vector<256x128xbf16>, vector<128x128xbf16>, vector<256x128xf32> -> vector<256x128xf32>
    %c0_4 = arith.constant 0 : index
    %c0_5 = arith.constant 0 : index
    %6 = vector.load %arg6[%c0_4, %c0_5] : memref<1x128xf32, #tpu.memory_space<vmem>>, vector<1x128xf32>
    %7 = vector.broadcast %6 : vector<1x128xf32> to vector<256x128xf32>
    %8 = arith.addf %5, %7 : vector<256x128xf32>
    %c0_6 = arith.constant 0 : index
    %c0_7 = arith.constant 0 : index
    %9 = vector.load %arg8[%c0_6, %c0_7] : memref<128x128xf32, #tpu.memory_space<vmem>>, vector<128x128xf32>
    %c0_8 = arith.constant 0 : index
    %c0_9 = arith.constant 0 : index
    %10 = vector.load %arg3[%c0_8, %c0_9] : memref<128x256xbf16, #tpu.memory_space<vmem>>, vector<128x256xbf16>
    %11 = arith.truncf %8 : vector<256x128xf32> to vector<256x128xbf16>
    %cst_10 = arith.constant dense<0.000000e+00> : vector<128x128xf32>
    %12 = tpu.matmul %10, %11, %cst_10 {dimension_numbers = #tpu.dot_dimension_numbers<[1], [0], [0], [1], [0, 0, 1, 1], [], []>} : vector<128x256xbf16>, vector<256x128xbf16>, vector<128x128xf32> -> vector<128x128xf32>
    %13 = arith.addf %9, %12 : vector<128x128xf32>
    %c0_11 = arith.constant 0 : index
    %c0_12 = arith.constant 0 : index
    %14 = vector.load %arg8[%c0_11, %c0_12] : memref<128x128xf32, #tpu.memory_space<vmem>>, vector<128x128xf32>
    tpu.vector_store %arg8[%c0_11, %c0_12], %13 {strides = array<i32>} : memref<128x128xf32, #tpu.memory_space<vmem>>, vector<128x128xf32>,
    %c0_i32_13 = arith.constant 0 : i32
    %15 = arith.cmpi eq, %arg2, %c0_i32_13 : i32
    %16 = arith.extui %15 : i1 to i32
    %c0_i32_14 = arith.constant 0 : i32
    %17 = arith.cmpi ne, %16, %c0_i32_14 : i32
    scf.if %17 {
      %c0_15 = arith.constant 0 : index
      %c0_16 = arith.constant 0 : index
      %18 = vector.load %arg8[%c0_15, %c0_16] : memref<128x128xf32, #tpu.memory_space<vmem>>, vector<128x128xf32>
      %c0_17 = arith.constant 0 : index
      %c0_18 = arith.constant 0 : index
      %19 = vector.load %arg7[%c0_17, %c0_18] : memref<128x128xf32, #tpu.memory_space<vmem>>, vector<128x128xf32>
      tpu.vector_store %arg7[%c0_17, %c0_18], %18 {strides = array<i32>} : memref<128x128xf32, #tpu.memory_space<vmem>>, vector<128x128xf32>,
    } else {
    }
    return
  }
  func.func @transform_0(%arg0: i32, %arg1: i32, %arg2: i32) -> (i32, i32) {
    %c0_i32 = arith.constant 0 : i32
    return %arg0, %arg2 : i32, i32
  }
  func.func @transform_1(%arg0: i32, %arg1: i32, %arg2: i32) -> (i32, i32) {
    %c0_i32 = arith.constant 0 : i32
    %c0_i32_0 = arith.constant 0 : i32
    return %arg2, %c0_i32 : i32, i32
  }
  func.func @transform_2(%arg0: i32, %arg1: i32, %arg2: i32) -> (i32, i32) {
    %c0_i32 = arith.constant 0 : i32
    %c0_i32_0 = arith.constant 0 : i32
    return %c0_i32, %arg1 : i32, i32
  }
  func.func @transform_3(%arg0: i32, %arg1: i32, %arg2: i32) -> (i32, i32) {
    %c0_i32 = arith.constant 0 : i32
    %c0_i32_0 = arith.constant 0 : i32
    return %c0_i32, %arg1 : i32, i32
  }
  func.func @transform_4(%arg0: i32, %arg1: i32, %arg2: i32) -> (i32, i32) {
    %c0_i32 = arith.constant 0 : i32
    return %arg0, %arg1 : i32, i32
  }
}

</mosaic_0001>

<bundles_post_ra>
// kernel: hgnn_conv.1
= control target key start
LH: loop header
LB: loop body
LE: loop exit
PB: predicated region body
PF: predicated region fallthrough
CT: control target
= control target key end

     0   :  { %9 = vsyncpa [#allocation4], 0  ;;  %s1788_s0 = inlined_call_operand.vmem [shape: bf16[256,256], index: 0, kind: input, shape index: {}]   ;;  %s1789_s1 = inlined_call_operand.vmem [shape: bf16[256,128], index: 1, kind: input, shape index: {}]   ;;  %s1790_s2 = inlined_call_operand.vmem [shape: bf16[128,128], index: 2, kind: input, shape index: {}]   ;;  %s1791_s3 = inlined_call_operand.vmem [shape: f32[1,128], index: 3, kind: input, shape index: {}]   ;;  %s1792_s4 = inlined_call_operand.hbm [shape: f32[256,128], index: 4, kind: output, shape index: {}]  }
   0x1   :  { %11 = vsyncpa [#allocation4 + $0x1], 0  ;;  %s1512_s15 = smov 0   ;;  %s1514_s16 = smov 0  }
   0x2   :  { %s1516_s17 = smov 0   ;;  %s1518_s18 = smov 0  }
   0x3   :  { %s1520_s19 = smov 0   ;;  %s1522_s20 = smov 0  }
   0x4 LB: > { %s1103_s21 = sadd.s32 4294967295, %s1482_s20   ;;  %s1104_s22 = sadd.s32 4294967294, %s1482_s20   ;;  %s1482_s20 = sphi %s1522_s20, %s17_s20   ;;  %s1478_s19 = sphi %s1520_s19, %s1799_s19   ;;  %s1474_s18 = sphi %s1518_s18, %s1798_s18   ;;  %s1470_s17 = sphi %s1516_s17, %s1797_s17   ;;  %s1466_s16 = sphi %s1514_s16, %s1796_s16   ;;  %s1462_s15 = sphi %s1512_s15, %s1795_s15  }
   0x5   : > { %s36_s23 = sadd.s32 1, %s1478_s19  ;;  %s151_s24 = sadd.s32 1, %s1470_s17 }
   0x6   : > { %p38_p0 = scmp.ge.s32.totalorder %s36_s23, 2  ;;  %p161_p1 = scmp.ne.s32.totalorder %s1470_s17, %s1466_s16 }
   0x7   : > { %p162_p2 = scmp.eq.s32.totalorder %s1103_s21, 1  ;;  %p167_p3 = scmp.ne.s32.totalorder %s1466_s16, %s1462_s15 }
   0x8   : > { %s1801_s23 = smov (%p38_p0, %s36_s23), 0  ;;  %p168_p5 = scmp.eq.s32.totalorder %s1104_s22, 1 }
   0x9   : > { %p1552_p4 = por %p162_p2, %p161_p1  ;;  %s146_s26 = ssub.s32 %s1478_s19, %s1801_s23 }
   0xa   : > { %p1110_p6 = scmp.ge.s32.totalorder %s1482_s20, 1  ;;  %p149_p7 = scmp.eq.s32.totalorder %s146_s26, 0 }
   0xb   : > { %p1559_p8 = por %p168_p5, %p167_p3  ;;  %p223_p9 = scmp.lt.s32.totalorder %s1482_s20, 3 }
   0xc   : > { %s1565_s28 = scalar_select %p149_p7, %s1470_s17, %s151_s24  }
   0xd   : > { %p224_p10 = pnand %p1110_p6, %p223_p9 }
   0xe   : > { %v1356_v0 = vld [vmem:[%s1790_s2] sm:$0xff] (!%p224_p10)   ;;  %v1357_v1 = vld [vmem:[%s1790_s2 + $0x8] sm:$0xff] (!%p224_p10)   ;;  %v1358_v2 = vld [vmem:[%s1790_s2 + $0x10] sm:$0xff] (!%p224_p10)   ;;  %s1112_s29 = sshll.u32 (!%p224_p10), %s1474_s18, 4  ;;  %s263_s10 = sand.u32 (!%p224_p10), 1, %s1466_s16  }
   0xf   : > { %227 = sbr.rel (%p224_p10) target bundleno = 618 (0x26a), region = 36  ;;  %1251 = vmatprep.subr.bf16.mxu0 (!%p224_p10), %v1356_v0  ;;  %v1359_v3 = vld [vmem:[%s1790_s2 + $0x18] sm:$0xff] (!%p224_p10)   ;;  %v1364_v4 = vld [vmem:[%s1789_s1] sm:$0xff] (!%p224_p10)   ;;  %v1361_v6 = vld [vmem:[%s1790_s2 + $0x28] sm:$0xff] (!%p224_p10)   ;;  %p268_p11 = scmp.lt.s32.totalorder (!%p224_p10), %s1112_s29, 31 }
  0x10   : > { %1252 = vmatpush3.bf16.msra.mxu0 (!%p224_p10), %v1356_v0  ;;  %1267 = vmatprep.mubr.bf16.mxu0 (!%p224_p10), %v1364_v4  ;;  %v1360_v5 = vld [vmem:[%s1790_s2 + $0x20] sm:$0xff] (!%p224_p10)   ;;  %v1362_v7 = vld [vmem:[%s1790_s2 + $0x30] sm:$0xff] (!%p224_p10)   ;;  %v1363_v8 = vld [vmem:[%s1790_s2 + $0x38] sm:$0xff] (!%p224_p10)   ;;  %s1111_s11 = sshll.u32 (!%p224_p10), %s263_s10, 7  ;;  %s1162_s13 = sshll.u32 (!%p224_p10), %s1474_s18, 11 }
  0x11   : > { %1253 = vmatprep.subr.bf16.mxu0 (!%p224_p10), %v1357_v1  ;;  %v1365_v9 = vld [vmem:[%s1789_s1 + $0x8] sm:$0xff] (!%p224_p10)   ;;  %v1366_v10 = vld [vmem:[%s1789_s1 + $0x10] sm:$0xff] (!%p224_p10)   ;;  %v1367_v11 = vld [vmem:[%s1789_s1 + $0x18] sm:$0xff] (!%p224_p10)   ;;  %s1713_s12 = scalar_lea.vmem (!%p224_p10), [#allocation3], %s1111_s11  ;;  %s1734_s24 = scalar_lea.hbm (!%p224_p10), %s1792_s4, %s1162_s13 }
  0x12   : > { %v1368_v12 = vld [vmem:[%s1789_s1 + $0x20] sm:$0xff] (!%p224_p10)   ;;  %v1369_v13 = vld [vmem:[%s1789_s1 + $0x28] sm:$0xff] (!%p224_p10)   ;;  %v1370_v14 = vld [vmem:[%s1789_s1 + $0x30] sm:$0xff] (!%p224_p10)   ;;  %s980_s14 = sshll.u32 (!%p224_p10), %s1713_s12, 4  ;;  %s1742_s18 = scalar_lea.sflag (!%p224_p10), [#allocation4], %s263_s10  ;;  %s1736_s14 = int_to_ptr.vmem [resolvable:$true] %s980_s14 }
  0x13   : > { %v1371_v15 = vld [vmem:[%s1789_s1 + $0x38] sm:$0xff] (!%p224_p10)   ;;  %v1372_v16 = vld [vmem:[%s1789_s1 + $0x40] sm:$0xff] (!%p224_p10)   ;;  %v1373_v17 = vld [vmem:[%s1789_s1 + $0x48] sm:$0xff] (!%p224_p10)   ;;  %s1404_s26 = scalar_lea.vmem (!%p224_p10), %s1736_s14, 2048 }
  0x14   : > { %1254 = vmatpush3.bf16.msra.mxu0 (!%p224_p10), %v1357_v1  ;;  %v1374_v18 = vld [vmem:[%s1789_s1 + $0x50] sm:$0xff] (!%p224_p10)   ;;  %v1375_v19 = vld [vmem:[%s1789_s1 + $0x58] sm:$0xff] (!%p224_p10)   ;;  %v1376_v20 = vld [vmem:[%s1789_s1 + $0x60] sm:$0xff] (!%p224_p10)   ;;  %p1405_p12 = scmp.ne.s32.totalorder (!%p224_p10), %s1736_s14, %s1404_s26 }
  0x15   : > { %1255 = vmatprep.subr.bf16.mxu0 (!%p224_p10), %v1358_v2  ;;  %v1377_v21 = vld [vmem:[%s1789_s1 + $0x68] sm:$0xff] (!%p224_p10)   ;;  %v1378_v22 = vld [vmem:[%s1789_s1 + $0x70] sm:$0xff] (!%p224_p10)   ;;  %v1379_v23 = vld [vmem:[%s1789_s1 + $0x78] sm:$0xff] (!%p224_p10)  }
  0x16   : > { %s1803_s29 = smov (!%p268_p11, %s1112_s29), 31  ;;  %v1649_v26 = vld [vmem:[%s1791_s3] ss:$0 sm:$0xff]  ;;  %p1406_p13 = pnand %p1405_p12, %p1552_p4 }
  0x17   : > { %s1161_s30 = sshll.u32 %s1803_s29, 3  ;;  %s1484_s29 = smov [#allocation3]  }
  0x18   : > { %1256 = vmatpush3.bf16.msra.mxu0 %v1358_v2  ;;  %s1643_s7 = scalar_lea.vmem %s1788_s0, %s1161_s30  ;;  %p1407_p0 = pneg %p1406_p13 }
  0x19   : > { %1257 = vmatprep.subr.bf16.mxu0 %v1359_v3  ;;  %v1382_v24 = vld [vmem:[%s1643_s7 + $0x4] ss:$8 sps:$4 sm:$0xff]   ;;  %s1408_s30 = sshll.u32 %s1484_s29, 4  ;;  %s1409_s30 = int_to_ptr.vmem [resolvable:$false] %s1408_s30 }
  0x1a   : > { %833 = vmatprep.mubr.bf16.mxu1 %v1382_v24  ;;  %s1410_s5 = scalar_lea.vmem %s1409_s30, 4096  ;;  %p1411_p1 = scmp.lt.s32.totalorder %s1736_s14, %s1409_s30 }
  0x1b   : > { %p1412_p2 = scmp.lt.s32.totalorder %s1410_s5, %s1404_s26 }
  0x1c   : > { %1258 = vmatpush3.bf16.msra.mxu0 %v1359_v3 }
  0x1d   : > { %1259 = vmatprep.subr.bf16.mxu0 %v1360_v5  ;;  %p1413_p3 = por %p1412_p2, %p1411_p1 }
  0x1f   : > { %p1414_p5 = pnand %p1413_p3, %p1407_p0 }
  0x20   : > { %1260 = vmatpush3.bf16.msra.mxu0 %v1360_v5 }
  0x21   : > { %1261 = vmatprep.subr.bf16.mxu0 %v1361_v6 }
  0x24   : > { %1262 = vmatpush3.bf16.msra.mxu0 %v1361_v6 }
  0x25   : > { %1263 = vmatprep.subr.bf16.mxu0 %v1362_v7 }
  0x28   : > { %1264 = vmatpush3.bf16.msra.mxu0 %v1362_v7 }
  0x29   : > { %1265 = vmatprep.subr.bf16.mxu0 %v1363_v8 }
  0x2c   : > { %1266 = vmatpush3.bf16.msra.mxu0 %v1363_v8 }
  0x2f   : > { %1268 = vmatmul.mubr.bf16.vlgmr.msra.gmra.mrb[0].mxu0 %v1365_v9 }
  0x30   : > { %1271 = vmatprep.mubr.bf16.mxu0 %v1366_v10 }
  0x37   : > { %1272 = vmatmul.mubr.bf16.gmra.mrb[4].mxu0 %v1367_v11 }
  0x38   : > { %1275 = vmatprep.mubr.bf16.mxu0 %v1368_v12 }
  0x3f   : > { %1276 = vmatmul.mubr.bf16.gmra.mrb[8].mxu0 %v1369_v13 }
  0x40   : > { %1279 = vmatprep.mubr.bf16.mxu0 %v1370_v14 }
  0x47   : > { %1280 = vmatmul.mubr.bf16.gmra.mrb[12].mxu0 %v1371_v15 }
  0x48   : > { %1283 = vmatprep.mubr.bf16.mxu0 %v1372_v16 }
  0x4f   : > { %1284 = vmatmul.mubr.bf16.gmra.mrb[16].mxu0 %v1373_v17 }
  0x50   : > { %1287 = vmatprep.mubr.bf16.mxu0 %v1374_v18 }
  0x57   : > { %1288 = vmatmul.mubr.bf16.gmra.mrb[20].mxu0 %v1375_v19 }
  0x58   : > { %1291 = vmatprep.mubr.bf16.mxu0 %v1376_v20 }
  0x5f   : > { %1292 = vmatmul.mubr.bf16.gmra.mrb[24].mxu0 %v1377_v21 }
  0x60   : > { %1295 = vmatprep.mubr.bf16.mxu0 %v1378_v22 }
  0x67   : > { %1296 = vmatmul.mubr.bf16.gmra.mrb[28].mxu0 %v1379_v23 }
 0x102   : > { %v1269_v25 = vpop.f32.mrb[0].mxu0 }
 0x103   : > { %v546_v27 = vpop.f32.mrb[1].mxu0  ;;  %v555_v29 = vadd.f32 %v1269_v25, %v1649_v26 }
 0x104   : > { %v1270_v28 = vpop.f32.mrb[2].mxu0  ;;  %v547_v32 = vadd.f32 %v1649_v26, %v546_v27 }
 0x105   : > { %v558_v30 = vadd.f32 %v1270_v28, %v1649_v26  ;;  %v549_v31 = vpop.f32.mrb[3].mxu0 }
 0x106   : > { %v550_v33 = vadd.f32 %v1649_v26, %v549_v31 }
 0x107   : > { %v706_v34 = vpack.c.bf16 %v558_v30, %v555_v29 }
 0x108   : > { %v705_v35 = vpack.c.bf16 %v550_v33, %v547_v32 }
 0x10a   : > { %v1273_v36 = vpop.f32.mrb[4].mxu0 }
 0x10b   : > { %v562_v37 = vpop.f32.mrb[5].mxu0  ;;  %v1656_v39 = vadd.f32 %v1273_v36, %v1649_v26 }
 0x10c   : > { %v1274_v38 = vpop.f32.mrb[6].mxu0  ;;  %v563_v42 = vadd.f32 %v1649_v26, %v562_v37 }
 0x10d   : > { %v574_v40 = vadd.f32 %v1274_v38, %v1649_v26  ;;  %v565_v41 = vpop.f32.mrb[7].mxu0 }
 0x10e   : > { %v566_v43 = vadd.f32 %v1649_v26, %v565_v41 }
 0x10f   : > { %v708_v44 = vpack.c.bf16 %v574_v40, %v1656_v39 }
 0x110   : > { %v707_v45 = vpack.c.bf16 %v566_v43, %v563_v42  ;;  %v1380_v43 = vld [vmem:[%s1643_s7] ss:$8 sps:$4 sm:$0xff]  }
 0x112   : > { %v1277_v46 = vpop.f32.mrb[8].mxu0 }
 0x113   : > { %v578_v47 = vpop.f32.mrb[9].mxu0  ;;  %v1663_v49 = vadd.f32 %v1277_v46, %v1649_v26  ;;  %v1388_v46 = vld [vmem:[%s1643_s7 + $0x20] ss:$8 sps:$4 sm:$0xff]  }
 0x114   : > { %v1278_v48 = vpop.f32.mrb[10].mxu0  ;;  %v579_v52 = vadd.f32 %v1649_v26, %v578_v47  ;;  %v1389_v47 = vld [vmem:[%s1643_s7 + $0x34] ss:$8 sps:$4 sm:$0xff]  }
 0x115   : > { %v1666_v50 = vadd.f32 %v1278_v48, %v1649_v26  ;;  %v581_v51 = vpop.f32.mrb[11].mxu0  ;;  %v1391_v48 = vld [vmem:[%s1643_s7 + $0x30] ss:$8 sps:$4 sm:$0xff]  }
 0x116   : > { %v582_v53 = vadd.f32 %v1649_v26, %v581_v51  ;;  %v1395_v51 = vld [vmem:[%s1643_s7 + $0x54] ss:$8 sps:$4 sm:$0xff]  }
 0x117   : > { %v710_v54 = vpack.c.bf16 %v1666_v50, %v1663_v49  ;;  %v1392_v49 = vld [vmem:[%s1643_s7 + $0x44] ss:$8 sps:$4 sm:$0xff]   ;;  %v1394_v50 = vld [vmem:[%s1643_s7 + $0x40] ss:$8 sps:$4 sm:$0xff]  }
 0x118   : > { %v709_v55 = vpack.c.bf16 %v582_v53, %v579_v52  ;;  %v1397_v52 = vld [vmem:[%s1643_s7 + $0x50] ss:$8 sps:$4 sm:$0xff]   ;;  %v1398_v53 = vld [vmem:[%s1643_s7 + $0x64] ss:$8 sps:$4 sm:$0xff]  }
 0x11a   : > { %v1281_v56 = vpop.f32.mrb[12].mxu0 }
 0x11b   : > { %v594_v57 = vpop.f32.mrb[13].mxu0  ;;  %v1673_v59 = vadd.f32 %v1281_v56, %v1649_v26  ;;  %v1403_v56 = vld [vmem:[%s1643_s7 + $0x70] ss:$8 sps:$4 sm:$0xff]  }
 0x11c   : > { %v1282_v58 = vpop.f32.mrb[14].mxu0  ;;  %v595_v62 = vadd.f32 %v1649_v26, %v594_v57 }
 0x11d   : > { %v606_v60 = vadd.f32 %v1282_v58, %v1649_v26  ;;  %v597_v61 = vpop.f32.mrb[15].mxu0 }
 0x11e   : > { %v598_v63 = vadd.f32 %v1649_v26, %v597_v61 }
 0x11f   : > { %v712_v0 = vpack.c.bf16 %v606_v60, %v1673_v59 }
 0x120   : > { %v711_v1 = vpack.c.bf16 %v598_v63, %v595_v62 }
 0x122   : > { %v1285_v2 = vpop.f32.mrb[16].mxu0 }
 0x123   : > { %v610_v3 = vpop.f32.mrb[17].mxu0  ;;  %v619_v5 = vadd.f32 %v1285_v2, %v1649_v26 }
 0x124   : > { %v1286_v4 = vpop.f32.mrb[18].mxu0  ;;  %v611_v8 = vadd.f32 %v1649_v26, %v610_v3 }
 0x125   : > { %v622_v6 = vadd.f32 %v1286_v4, %v1649_v26  ;;  %v613_v7 = vpop.f32.mrb[19].mxu0 }
 0x126   : > { %v614_v9 = vadd.f32 %v1649_v26, %v613_v7 }
 0x127   : > { %v714_v10 = vpack.c.bf16 %v622_v6, %v619_v5 }
 0x128   : > { %v713_v11 = vpack.c.bf16 %v614_v9, %v611_v8 }
 0x12a   : > { %v1289_v12 = vpop.f32.mrb[20].mxu0  ;;  %1187 = vmatprep.subr.bf16.mxu1 %v713_v11 }
 0x12b   : > { %v626_v13 = vpop.f32.mrb[21].mxu0  ;;  %1188 = vmatpush3.bf16.msra.mxu1 %v705_v35  ;;  %v635_v15 = vadd.f32 %v1289_v12, %v1649_v26 }
 0x12c   : > { %v1290_v14 = vpop.f32.mrb[22].mxu0  ;;  %1189 = vmatprep.subr.bf16.mxu1 %v714_v10  ;;  %v627_v18 = vadd.f32 %v1649_v26, %v626_v13 }
 0x12d   : > { %v638_v16 = vadd.f32 %v1290_v14, %v1649_v26  ;;  %v629_v17 = vpop.f32.mrb[23].mxu0 }
 0x12e   : > { %v630_v19 = vadd.f32 %v1649_v26, %v629_v17 }
 0x12f   : > { %v716_v20 = vpack.c.bf16 %v638_v16, %v635_v15  ;;  %1190 = vmatpush3.bf16.msra.mxu1 %v706_v34 }
 0x130   : > { %v715_v21 = vpack.c.bf16 %v630_v19, %v627_v18 }
 0x132   : > { %v1293_v22 = vpop.f32.mrb[24].mxu0  ;;  %1191 = vmatprep.subr.bf16.mxu1 %v715_v21 }
 0x133   : > { %v642_v23 = vpop.f32.mrb[25].mxu0  ;;  %1192 = vmatpush3.bf16.msra.mxu1 %v707_v45  ;;  %v651_v25 = vadd.f32 %v1293_v22, %v1649_v26  ;;  %v1385_v45 = vld [vmem:[%s1643_s7 + $0x10] ss:$8 sps:$4 sm:$0xff]  }
 0x134   : > { %v1294_v24 = vpop.f32.mrb[26].mxu0  ;;  %1193 = vmatprep.subr.bf16.mxu1 %v716_v20  ;;  %v643_v29 = vadd.f32 %v1649_v26, %v642_v23 }
 0x135   : > { %v654_v27 = vadd.f32 %v1294_v24, %v1649_v26  ;;  %v645_v28 = vpop.f32.mrb[27].mxu0 }
 0x136   : > { %v646_v30 = vadd.f32 %v1649_v26, %v645_v28 }
 0x137   : > { %v718_v31 = vpack.c.bf16 %v654_v27, %v651_v25  ;;  %1194 = vmatpush3.bf16.msra.mxu1 %v708_v44  ;;  %v1383_v44 = vld [vmem:[%s1643_s7 + $0x14] ss:$8 sps:$4 sm:$0xff]  }
 0x138   : > { %v717_v32 = vpack.c.bf16 %v646_v30, %v643_v29 }
 0x13a   : > { %v1297_v33 = vpop.f32.mrb[28].mxu0  ;;  %1195 = vmatprep.subr.bf16.mxu1 %v717_v32 }
 0x13b   : > { %v658_v34 = vpop.f32.mrb[29].mxu0  ;;  %1196 = vmatpush3.bf16.msra.mxu1 %v709_v55  ;;  %v667_v36 = vadd.f32 %v1297_v33, %v1649_v26  ;;  %v1401_v55 = vld [vmem:[%s1643_s7 + $0x74] ss:$8 sps:$4 sm:$0xff]  }
 0x13c   : > { %v1298_v35 = vpop.f32.mrb[30].mxu0  ;;  %1197 = vmatprep.subr.bf16.mxu1 %v718_v31  ;;  %v659_v39 = vadd.f32 %v1649_v26, %v658_v34 }
 0x13d   : > { %v670_v37 = vadd.f32 %v1298_v35, %v1649_v26  ;;  %v661_v38 = vpop.f32.mrb[31].mxu0 }
 0x13e   : > { %v662_v40 = vadd.f32 %v1649_v26, %v661_v38  ;;  %v1386_v26 = vld [vmem:[%s1643_s7 + $0x24] ss:$8 sps:$4 sm:$0xff]  }
 0x13f   : > { %v720_v41 = vpack.c.bf16 %v670_v37, %v667_v36  ;;  %1198 = vmatpush3.bf16.msra.mxu1 %v710_v54  ;;  %v1400_v54 = vld [vmem:[%s1643_s7 + $0x60] ss:$8 sps:$4 sm:$0xff]  }
 0x140   : > { %v719_v42 = vpack.c.bf16 %v662_v40, %v659_v39 }
 0x142   : > { %1199 = vmatprep.subr.bf16.mxu1 %v719_v42 }
 0x143   : > { %1200 = vmatpush3.bf16.msra.mxu1 %v711_v1 }
 0x144   : > { %1201 = vmatprep.subr.bf16.mxu1 %v720_v41 }
 0x147   : > { %1202 = vmatpush3.bf16.msra.mxu1 %v712_v0 }
 0x14a   : > { %834 = vmatmul.mubr.bf16.vlgmr.msra.gmra.mrb[0].mxu1 %v1380_v43 }
 0x14b   : > { %841 = vmatprep.mubr.bf16.mxu1 %v1383_v44 }
 0x152   : > { %842 = vmatmul.mubr.bf16.gmra.mrb[4].mxu1 %v1385_v45 }
 0x153   : > { %849 = vmatprep.mubr.bf16.mxu1 %v1386_v26 }
 0x15a   : > { %850 = vmatmul.mubr.bf16.gmra.mrb[8].mxu1 %v1388_v46 }
 0x15b   : > { %857 = vmatprep.mubr.bf16.mxu1 %v1389_v47 }
 0x162   : > { %858 = vmatmul.mubr.bf16.gmra.mrb[12].mxu1 %v1391_v48 }
 0x163   : > { %865 = vmatprep.mubr.bf16.mxu1 %v1392_v49 }
 0x16a   : > { %866 = vmatmul.mubr.bf16.gmra.mrb[16].mxu1 %v1394_v50 }
 0x16b   : > { %873 = vmatprep.mubr.bf16.mxu1 %v1395_v51 }
 0x172   : > { %874 = vmatmul.mubr.bf16.gmra.mrb[20].mxu1 %v1397_v52 }
 0x173   : > { %881 = vmatprep.mubr.bf16.mxu1 %v1398_v53 }
 0x17a   : > { %882 = vmatmul.mubr.bf16.gmra.mrb[24].mxu1 %v1400_v54 }
 0x17b   : > { %889 = vmatprep.mubr.bf16.mxu1 %v1401_v55 }
 0x182   : > { %890 = vmatmul.mubr.bf16.gmra.mrb[28].mxu1 %v1403_v56 }
 0x21d   : > { %v1203_v57 = vpop.f32.mrb[0].mxu1 }
 0x21e   : > { %v1204_v58 = vpop.f32.mrb[1].mxu1 }
 0x21f   : > { %v1205_v59 = vadd.f32 %v1204_v58, %v1203_v57  ;;  %v1206_v60 = vpop.f32.mrb[2].mxu1 }
 0x220   : > { %v1207_v61 = vpop.f32.mrb[3].mxu1 }
 0x221   : > { %949 = vst [vmem:[%s1713_s12] sm:$0xff] %v1205_v59  ;;  %v1208_v62 = vadd.f32 %v1207_v61, %v1206_v60 }
 0x223   : > { %950 = vst [vmem:[%s1713_s12 + $0x8] sm:$0xff] %v1208_v62 }
 0x225   : > { %v1209_v63 = vpop.f32.mrb[4].mxu1 }
 0x226   : > { %v1210_v0 = vpop.f32.mrb[5].mxu1 }
 0x227   : > { %v1211_v1 = vadd.f32 %v1210_v0, %v1209_v63  ;;  %v1212_v2 = vpop.f32.mrb[6].mxu1 }
 0x228   : > { %v1213_v3 = vpop.f32.mrb[7].mxu1 }
 0x229   : > { %951 = vst [vmem:[%s1713_s12 + $0x10] sm:$0xff] %v1211_v1  ;;  %v1214_v4 = vadd.f32 %v1213_v3, %v1212_v2 }
 0x22b   : > { %952 = vst [vmem:[%s1713_s12 + $0x18] sm:$0xff] %v1214_v4 }
 0x22d   : > { %v1215_v5 = vpop.f32.mrb[8].mxu1 }
 0x22e   : > { %v1216_v6 = vpop.f32.mrb[9].mxu1 }
 0x22f   : > { %v1217_v7 = vadd.f32 %v1216_v6, %v1215_v5  ;;  %v1218_v8 = vpop.f32.mrb[10].mxu1 }
 0x230   : > { %v1219_v9 = vpop.f32.mrb[11].mxu1 }
 0x231   : > { %953 = vst [vmem:[%s1713_s12 + $0x20] sm:$0xff] %v1217_v7  ;;  %v1220_v10 = vadd.f32 %v1219_v9, %v1218_v8 }
 0x233   : > { %954 = vst [vmem:[%s1713_s12 + $0x28] sm:$0xff] %v1220_v10 }
 0x235   : > { %v1221_v11 = vpop.f32.mrb[12].mxu1 }
 0x236   : > { %v1222_v12 = vpop.f32.mrb[13].mxu1 }
 0x237   : > { %v1223_v13 = vadd.f32 %v1222_v12, %v1221_v11  ;;  %v1224_v14 = vpop.f32.mrb[14].mxu1 }
 0x238   : > { %v1225_v15 = vpop.f32.mrb[15].mxu1 }
 0x239   : > { %955 = vst [vmem:[%s1713_s12 + $0x30] sm:$0xff] %v1223_v13  ;;  %v1226_v16 = vadd.f32 %v1225_v15, %v1224_v14 }
 0x23b   : > { %956 = vst [vmem:[%s1713_s12 + $0x38] sm:$0xff] %v1226_v16 }
 0x23d   : > { %v1227_v17 = vpop.f32.mrb[16].mxu1 }
 0x23e   : > { %v1228_v18 = vpop.f32.mrb[17].mxu1 }
 0x23f   : > { %v1229_v19 = vadd.f32 %v1228_v18, %v1227_v17  ;;  %v1230_v20 = vpop.f32.mrb[18].mxu1 }
 0x240   : > { %v1231_v21 = vpop.f32.mrb[19].mxu1 }
 0x241   : > { %957 = vst [vmem:[%s1713_s12 + $0x40] sm:$0xff] %v1229_v19  ;;  %v1232_v22 = vadd.f32 %v1231_v21, %v1230_v20 }
 0x243   : > { %958 = vst [vmem:[%s1713_s12 + $0x48] sm:$0xff] %v1232_v22 }
 0x245   : > { %v1233_v23 = vpop.f32.mrb[20].mxu1 }
 0x246   : > { %v1234_v24 = vpop.f32.mrb[21].mxu1 }
 0x247   : > { %v1235_v25 = vadd.f32 %v1234_v24, %v1233_v23  ;;  %v1236_v27 = vpop.f32.mrb[22].mxu1 }
 0x248   : > { %v1237_v28 = vpop.f32.mrb[23].mxu1 }
 0x249   : > { %959 = vst [vmem:[%s1713_s12 + $0x50] sm:$0xff] %v1235_v25  ;;  %v1238_v29 = vadd.f32 %v1237_v28, %v1236_v27 }
 0x24b   : > { %960 = vst [vmem:[%s1713_s12 + $0x58] sm:$0xff] %v1238_v29 }
 0x24d   : > { %v1239_v30 = vpop.f32.mrb[24].mxu1 }
 0x24e   : > { %v1240_v31 = vpop.f32.mrb[25].mxu1 }
 0x24f   : > { %v1241_v32 = vadd.f32 %v1240_v31, %v1239_v30  ;;  %v1242_v33 = vpop.f32.mrb[26].mxu1 }
 0x250   : > { %v1243_v34 = vpop.f32.mrb[27].mxu1 }
 0x251   : > { %961 = vst [vmem:[%s1713_s12 + $0x60] sm:$0xff] %v1241_v32  ;;  %v1244_v35 = vadd.f32 %v1243_v34, %v1242_v33 }
 0x253   : > { %962 = vst [vmem:[%s1713_s12 + $0x68] sm:$0xff] %v1244_v35 }
 0x255   : > { %v1245_v36 = vpop.f32.mrb[28].mxu1 }
 0x256   : > { %v1246_v37 = vpop.f32.mrb[29].mxu1 }
 0x257   : > { %v1247_v38 = vadd.f32 %v1246_v37, %v1245_v36  ;;  %v1248_v39 = vpop.f32.mrb[30].mxu1 }
 0x258   : > { %v1249_v40 = vpop.f32.mrb[31].mxu1 }
 0x259   : > { %963 = vst [vmem:[%s1713_s12 + $0x70] sm:$0xff] %v1247_v38  ;;  %v1250_v41 = vadd.f32 %v1249_v40, %v1248_v39 }
 0x25b   : > { %964 = vst [vmem:[%s1713_s12 + $0x78] sm:$0xff] %v1250_v41 }
 0x25c   : > { %1417 = shalt.err (!%p1414_p5)
}
 0x25d   : > { %s1418_s6 = scalar_lea.hbm %s1734_s24, 2048  ;;  %s1422_s9 = scalar_lea.hbm %s1792_s4, 4096 }
 0x25e   : > { %p1419_p6 = scmp.ne.s32.totalorder %s1734_s24, %s1418_s6  ;;  %p1423_p10 = scmp.lt.u32.totalorder %s1734_s24, %s1792_s4 }
 0x25f   : > { %p1424_p11 = scmp.lt.u32.totalorder %s1422_s9, %s1418_s6  ;;  %p1426_p13 = scmp.lt.u32.totalorder %s1418_s6, %s1734_s24 }
 0x260   : > { %p1420_p7 = pnand %p1419_p6, %p1552_p4 }
 0x261   : > { %p1425_p12 = por %p1424_p11, %p1423_p10 }
 0x262   : > { %p1421_p9 = pneg %p1420_p7 }
 0x263   : > { %p1427_p0 = por %p1426_p13, %p1425_p12 }
 0x265   : > { %p1428_p1 = pnand %p1427_p0, %p1421_p9 }
 0x267   : > { %1431 = shalt.err (!%p1428_p1)
}
 0x268   : > { %s1485_s12 = smov 128   ;;  %s1486_s13 = smov 8  }
 0x269   : > { %1299 = dma.vmem_to_hbm [thread:$0]  (%p1552_p4), %s1736_s14, 2048, %s1734_s24, %s1742_s18, %s1485_s12, %s1485_s12, %s1486_s13  }
 0x26a PF: > { %p1305_p2 = scmp.ge.s32.totalorder %s1482_s20, 2  ;;  %s995_s21 = sand.u32 1, %s1462_s15  }
 0x26b   : > { %s996_s22 = scalar_lea.sflag [#allocation4], %s995_s21 }
 0x26c   : > { %p1302_p3 = pnand %p1305_p2, %p1559_p8 }
 0x26e   : > { %1457 = dma.done.wait (!%p1302_p3), %s996_s22, 2048  }
 0x26f   : > { %1459 = vsyncadd (!%p1302_p3), %s996_s22, 4294965248  ;;  %s17_s20 = sadd.s32 1, %s1482_s20   ;;  %s1795_s15 = smov %s1466_s16 }
 0x270   : > { %p14_p5 = scmp.ge.s32.totalorder %s17_s20, 4   ;;  %s1796_s16 = smov %s1470_s17 }
 0x271   : > { %s1797_s17 = smov %s1565_s28  ;;  %s1798_s18 = smov %s1478_s19 }
 0x272   : > { %s1799_s19 = smov %s1801_s23  ;;  %16 = sbr.rel (!%p14_p5) target bundleno = 4 (0x4), region = 88 }
 0x279   :  { %1001 = vsyncpa [#allocation4], 1 }
 0x27a   :  { %1003 = vsyncpa [#allocation4 + $0x1], 1 }

</bundles_post_ra>
